<compile_context>
chip_gen: v6e
topology: v6e:2x2x1
jax: 0.10.0
libtpu: 0.0.40
codegen_flags: <defaults>
</compile_context>

<pallas_src>
import functools
import math

import jax
import jax.numpy as jnp
from jax.experimental import pallas as pl
from jax.experimental.pallas import tpu as pltpu


def _gelu_exact(x):
    # PyTorch nn.GELU() default: exact erf formulation.
    return 0.5 * x * (1.0 + jax.lax.erf(x * (1.0 / math.sqrt(2.0))))


# --------------------------- tiling / budget helpers ------------------------
def _round_up(n, m):
    return (n + m - 1) // m * m


def _vmem_budget_bytes():
    """Generation-aware scoped-VMEM budget.

    ~75% of physical VMEM, capped at 100 MiB: ~96 MiB on v5e/v6e (128 MiB
    parts), ~48 MiB on v7x (64 MiB per TensorCore).  Falls back to a v7x-safe
    48 MiB if the hardware query is unavailable.
    """
    cap = 64 << 20
    try:
        info = pltpu.get_tpu_info()
        cap = int(getattr(info, "vmem_capacity_bytes", cap))
    except Exception:
        pass
    return min(cap * 3 // 4, 100 << 20)


def _pick_col_tile(n_cols, n_rows, itemsize, budget_bytes, *, even_tiles=True):
    """Widest 128-multiple column tile whose double-buffered weight stream fits
    `budget_bytes`.  Does NOT require the tile to divide n_cols (column axis is
    an output axis; ragged last tiles are handled via cdiv grids).  If
    `even_tiles`, keep the tile count even (>= 2) so the "parallel" grid axis
    splits evenly across v7x's two TensorCores (harmless on v5e/v6e).
    """
    per_col = 2 * n_rows * itemsize  # double-buffered bytes per tile column
    cap = max(128, (budget_bytes // per_col) // 128 * 128)
    tile = min(_round_up(n_cols, 128), cap)
    n_tiles = pl.cdiv(n_cols, tile)
    if even_tiles and (n_tiles < 2 or n_tiles % 2 == 1):
        n_tiles = max(2, n_tiles + (n_tiles % 2))
        tile = min(cap, max(128, _round_up(pl.cdiv(n_cols, n_tiles), 128)))
    return tile


# ---------------------------------------------------------------------------
# Linear1: y1 = GELU(x @ W1 + b1), tiled over the H1 output columns.
# ---------------------------------------------------------------------------
def linear1_kernel(x_ref, w1_ref, b1_ref, y1_ref):
    # TODO(synk): Dropout(0.2) omitted (eval-mode identity).
    x = x_ref[...].astype(w1_ref.dtype)  # bf16 MXU operands, f32 accumulate
    h = jnp.dot(x, w1_ref[...], preferred_element_type=jnp.float32)
    y1_ref[...] = _gelu_exact(h + b1_ref[...]).astype(y1_ref.dtype)


# ---------------------------------------------------------------------------
# Linear2: out = GELU(y1 @ W2 + b2)
# grid = (cdiv(N2, tn), H1 // tk); j (W2 column tiles) is "parallel", k
# (reduction over H1) is "arbitrary" with a (B, tn) f32 accumulator and
# pl.when init/finalize.  y1 is fully VMEM-resident and sliced in-kernel.
# ---------------------------------------------------------------------------
def linear2_kernel(tk, y1_ref, w2_ref, b2_ref, out_ref, acc_ref):
    k = pl.program_id(1)

    @pl.when(k == 0)
    def _():
        acc_ref[...] = jnp.zeros_like(acc_ref)

    k_off = pl.multiple_of(k * tk, 128)
    y1_blk = y1_ref[:, pl.ds(k_off, tk)]  # resident y1: slice, no per-step DMA
    acc_ref[...] += jnp.dot(y1_blk, w2_ref[...], preferred_element_type=jnp.float32)

    @pl.when(k == pl.num_programs(1) - 1)
    def _():
        out_ref[...] = _gelu_exact(acc_ref[...] + b2_ref[...]).astype(out_ref.dtype)


def map_model_forward(x, w1, b1, w2, b2, seq_len, *, weight_dtype=jnp.bfloat16,
                      vmem_limit_bytes=None):
    """x: [B, 768] -> out: [B, seq_len, 768]."""
    B, D = x.shape
    H1 = w1.shape[1]
    N2 = w2.shape[1]
    assert N2 == seq_len * 768
    assert H1 > 0 and H1 % 768 == 0, "max_length must be >= 8 so H1=(L//7)*768 > 0"

    if vmem_limit_bytes is None:
        vmem_limit_bytes = _vmem_budget_bytes()

    wbytes = jnp.dtype(weight_dtype).itemsize
    w1 = w1.astype(weight_dtype)  # stream weights in bf16 (halves HBM bytes)
    w2 = w2.astype(weight_dtype)
    b1 = b1.reshape(1, H1).astype(jnp.float32)
    b2 = b2.reshape(1, N2).astype(jnp.float32)

    # --- Linear1 (small; HBM-bound on W1): tile over H1 output columns ------
    th = _pick_col_tile(H1, D, wbytes, budget_bytes=vmem_limit_bytes // 2)
    cost1 = pl.CostEstimate(
        flops=2 * B * D * H1,
        transcendentals=B * H1,
        bytes_accessed=B * D * 4 + D * H1 * wbytes + H1 * 4 + B * H1 * wbytes,
    )
    y1 = pl.pallas_call(
        linear1_kernel,
        out_shape=jax.ShapeDtypeStruct((B, H1), weight_dtype),
        grid_spec=pltpu.PrefetchScalarGridSpec(
            num_scalar_prefetch=0,
            grid=(pl.cdiv(H1, th),),
            in_specs=[
                pl.BlockSpec((B, D), lambda j: (0, 0)),    # x (tiny, resident)
                pl.BlockSpec((D, th), lambda j: (0, j)),   # W1 column tile
                pl.BlockSpec((1, th), lambda j: (0, j)),   # b1 column tile
            ],
            out_specs=pl.BlockSpec((B, th), lambda j: (0, j)),
        ),
        compiler_params=pltpu.CompilerParams(
            dimension_semantics=("parallel",),
            vmem_limit_bytes=vmem_limit_bytes,
        ),
        cost_estimate=cost1,
    )(x, w1, b1)

    # --- Linear2 (dominant cost: stream W2 at full HBM rate) ----------------
    tk = min(H1, 768)  # exact divisor of H1 (clean K accumulation)
    tn = _pick_col_tile(N2, tk, wbytes, budget_bytes=(vmem_limit_bytes * 4) // 5)
    cost2 = pl.CostEstimate(
        flops=2 * B * H1 * N2,
        transcendentals=B * N2,
        bytes_accessed=B * H1 * wbytes + H1 * N2 * wbytes + N2 * 4 + B * N2 * 4,
    )
    out = pl.pallas_call(
        functools.partial(linear2_kernel, tk),
        out_shape=jax.ShapeDtypeStruct((B, N2), x.dtype),
        grid_spec=pltpu.PrefetchScalarGridSpec(
            num_scalar_prefetch=0,
            grid=(pl.cdiv(N2, tn), H1 // tk),  # parallel cols, reduction last
            in_specs=[
                pl.BlockSpec((B, H1), lambda j, k: (0, 0)),   # y1 fully resident
                pl.BlockSpec((tk, tn), lambda j, k: (k, j)),  # W2 tile (big stream)
                pl.BlockSpec((1, tn), lambda j, k: (0, j)),   # b2 tile
            ],
            out_specs=pl.BlockSpec((B, tn), lambda j, k: (0, j)),
            scratch_shapes=[pltpu.VMEM((B, tn), jnp.float32)],
        ),
        compiler_params=pltpu.CompilerParams(
            dimension_semantics=("parallel", "arbitrary"),
            vmem_limit_bytes=vmem_limit_bytes,
        ),
        cost_estimate=cost2,
    )(y1, w2, b2)

    return out.reshape(B, seq_len, 768)


def init_params(key, max_length):
    """Deterministic parameter init matching the module's shapes.

    PyTorch Linear default init: U(-1/sqrt(fan_in), 1/sqrt(fan_in)).
    Weights are stored as (in_features, out_features).
    """
    L = max_length - 1
    H1 = (L // 7) * 768
    N2 = L * 768
    k1, k2, k3, k4 = jax.random.split(key, 4)
    s1 = 1.0 / math.sqrt(768)
    s2 = 1.0 / math.sqrt(H1)
    w1 = jax.random.uniform(k1, (768, H1), jnp.float32, -s1, s1)
    b1 = jax.random.uniform(k2, (H1,), jnp.float32, -s1, s1)
    w2 = jax.random.uniform(k3, (H1, N2), jnp.float32, -s2, s2)
    b2 = jax.random.uniform(k4, (N2,), jnp.float32, -s2, s2)
    return w1, b1, w2, b2


if __name__ == "__main__":
    # Small config consistent with the module: max_length=8 -> L=7,
    # linear1: 768 -> 768, linear2: 768 -> 7*768 = 5376.
    MAX_LENGTH = 8
    L = MAX_LENGTH - 1
    B = 2

    key = jax.random.PRNGKey(0)
    kx, kp = jax.random.split(key)
    x = jax.random.normal(kx, (B, 768), jnp.float32)
    w1, b1, w2, b2 = init_params(kp, MAX_LENGTH)

    out = map_model_forward(x, w1, b1, w2, b2, seq_len=L)
    out = jax.block_until_ready(out)

    # Matched-precision pure-JAX reference (bf16 weight stream, f32 accumulate,
    # dropout = identity, exact erf GELU). bf16 weights deviate slightly from
    # the f32 PyTorch module by design (bandwidth optimization).
    wd = jnp.bfloat16
    h1 = _gelu_exact(
        jnp.dot(x.astype(wd), w1.astype(wd), preferred_element_type=jnp.float32) + b1
    )
    y1_ref = h1.astype(wd)
    h2 = _gelu_exact(
        jnp.dot(y1_ref, w2.astype(wd), preferred_element_type=jnp.float32) + b2
    )
    ref = h2.astype(x.dtype).reshape(B, L, 768)

    assert out.shape == (B, L, 768)
    assert jnp.allclose(out, ref, atol=2e-3, rtol=2e-2), float(
        jnp.max(jnp.abs(out - ref))
    )

    print("KERNEL_OK")
</pallas_src>

<mosaic_0001>
module attributes {stable_mosaic.version = 11 : i64} {
  func.func @linear1_kernel(%arg0: i32, %arg1: memref<2x768xf32, #tpu.memory_space<vmem>>, %arg2: memref<768x384xbf16, #tpu.memory_space<vmem>>, %arg3: memref<1x384xf32, #tpu.memory_space<vmem>>, %arg4: memref<2x384xbf16, #tpu.memory_space<vmem>>) attributes {dimension_semantics = [#tpu.dimension_semantics<parallel>], iteration_bounds = array<i64: 2>, scalar_prefetch = 0 : i64, scratch_operands = 0 : i64, tpu.core_type = #tpu.core_type<tc>, window_params = [{pipeline_mode = #tpu.pipeline_mode<synchronous>, transform_indices = @transform_0, window_bounds = array<i64: 2, 768>}, {transform_indices = @transform_1, window_bounds = array<i64: 768, 384>}, {transform_indices = @transform_2, window_bounds = array<i64: 1, 384>}, {transform_indices = @transform_3, window_bounds = array<i64: 2, 384>}]} {
    %c0 = arith.constant 0 : index
    %c0_0 = arith.constant 0 : index
    %0 = vector.load %arg1[%c0, %c0_0] : memref<2x768xf32, #tpu.memory_space<vmem>>, vector<2x768xf32>
    %1 = arith.truncf %0 : vector<2x768xf32> to vector<2x768xbf16>
    %c0_1 = arith.constant 0 : index
    %c0_2 = arith.constant 0 : index
    %2 = vector.load %arg2[%c0_1, %c0_2] : memref<768x384xbf16, #tpu.memory_space<vmem>>, vector<768x384xbf16>
    %cst = arith.constant dense<0.000000e+00> : vector<2x384xf32>
    %3 = tpu.matmul %1, %2, %cst {dimension_numbers = #tpu.dot_dimension_numbers<[1], [0], [0], [1], [0, 0, 1, 1], [], []>} : vector<2x768xbf16>, vector<768x384xbf16>, vector<2x384xf32> -> vector<2x384xf32>
    %c0_3 = arith.constant 0 : index
    %c0_4 = arith.constant 0 : index
    %4 = vector.load %arg3[%c0_3, %c0_4] : memref<1x384xf32, #tpu.memory_space<vmem>>, vector<1x384xf32>
    %5 = vector.broadcast %4 : vector<1x384xf32> to vector<2x384xf32>
    %6 = arith.addf %3, %5 : vector<2x384xf32>
    %cst_5 = arith.constant 5.000000e-01 : f32
    %7 = vector.broadcast %cst_5 : f32 to vector<2x384xf32>
    %8 = arith.mulf %7, %6 : vector<2x384xf32>
    %cst_6 = arith.constant 0.707106769 : f32
    %9 = vector.broadcast %cst_6 : f32 to vector<2x384xf32>
    %10 = arith.mulf %6, %9 : vector<2x384xf32>
    %11 = math.erf %10 : vector<2x384xf32>
    %cst_7 = arith.constant 1.000000e+00 : f32
    %12 = vector.broadcast %cst_7 : f32 to vector<2x384xf32>
    %13 = arith.addf %12, %11 : vector<2x384xf32>
    %14 = arith.mulf %8, %13 : vector<2x384xf32>
    %15 = arith.truncf %14 : vector<2x384xf32> to vector<2x384xbf16>
    %c0_8 = arith.constant 0 : index
    %c0_9 = arith.constant 0 : index
    %16 = vector.load %arg4[%c0_8, %c0_9] : memref<2x384xbf16, #tpu.memory_space<vmem>>, vector<2x384xbf16>
    tpu.vector_store %arg4[%c0_8, %c0_9], %15 {strides = array<i32>} : memref<2x384xbf16, #tpu.memory_space<vmem>>, vector<2x384xbf16>,
    return
  }
  func.func @transform_0(%arg0: i32) -> (i32, i32) {
    %c0_i32 = arith.constant 0 : i32
    %c0_i32_0 = arith.constant 0 : i32
    %c0_i32_1 = arith.constant 0 : i32
    return %c0_i32, %c0_i32_0 : i32, i32
  }
  func.func @transform_1(%arg0: i32) -> (i32, i32) {
    %c0_i32 = arith.constant 0 : i32
    %c0_i32_0 = arith.constant 0 : i32
    return %c0_i32, %arg0 : i32, i32
  }
  func.func @transform_2(%arg0: i32) -> (i32, i32) {
    %c0_i32 = arith.constant 0 : i32
    %c0_i32_0 = arith.constant 0 : i32
    return %c0_i32, %arg0 : i32, i32
  }
  func.func @transform_3(%arg0: i32) -> (i32, i32) {
    %c0_i32 = arith.constant 0 : i32
    %c0_i32_0 = arith.constant 0 : i32
    return %c0_i32, %arg0 : i32, i32
  }
}

</mosaic_0001>

<bundles_post_ra>
// kernel: tpu_custom_call.1
= control target key start
LH: loop header
LB: loop body
LE: loop exit
PB: predicated region body
PF: predicated region fallthrough
CT: control target
= control target key end

     0   :  { %8 = vsyncpa [#allocation3], 0  ;;  %s2732_s0 = inlined_call_operand.hbm [shape: f32[2,768], index: 0, kind: input, shape index: {}]   ;;  %s2733_s1 = inlined_call_operand.hbm [shape: bf16[768,768], index: 1, kind: input, shape index: {}]   ;;  %s2734_s2 = inlined_call_operand.hbm [shape: f32[1,768], index: 2, kind: input, shape index: {}]   ;;  %s2735_s3 = inlined_call_operand.hbm [shape: bf16[2,768], index: 3, kind: output, shape index: {}]  }
   0x1   :  { %9 = vsyncpa [#allocation6], 0 }
   0x2   :  { %11 = vsyncpa [#allocation6 + $0x1], 0 }
   0x3   :  { %12 = vsyncpa [#allocation4], 0 }
   0x4   :  { %14 = vsyncpa [#allocation4 + $0x1], 0  ;;  %s2343_s12 = smov 0   ;;  %s2345_s13 = smov 0  }
   0x5   :  { %s2347_s14 = smov 0   ;;  %s2349_s15 = smov 0  }
   0x6 LB: > { %s2364_s16 = sadd.s32 1, %s2312_s15   ;;  %s48_s17 = sadd.s32 1, %s2308_s14  ;;  %s2312_s15 = sphi %s2349_s15, %s2757_s15   ;;  %s2308_s14 = sphi %s2347_s14, %s2756_s14   ;;  %s2304_s13 = sphi %s2345_s13, %s2755_s13   ;;  %s2300_s12 = sphi %s2343_s12, %s2754_s12  }
   0x7   : > { %s45_s18 = ssub.s32 %s2312_s15, %s2364_s16  ;;  %p55_p0 = scmp.ne.s32.totalorder %s2308_s14, %s2304_s13 }
   0x8   : > { %p46_p1 = scmp.eq.s32.totalorder %s45_s18, 0  ;;  %p56_p2 = scmp.eq.s32.totalorder %s2312_s15, 0 }
   0x9   : > { %p1922_p4 = scmp.lt.s32.totalorder %s2312_s15, 2  ;;  %s148_s20 = sand.u32 1, %s2312_s15  }
   0xa   : > { %s2375_s19 = scalar_select %p46_p1, %s2308_s14, %s48_s17  }
   0xb   : > { %p57_p5 = por %p56_p2, %p55_p0  ;;  %s150_s21 = sand.u32 1, %s2308_s14  }
   0xc   : > { %s1892_s22 = smul.u32 1152, %s150_s21  ;;  %s2396_s30 = scalar_lea.sflag [#allocation6], %s148_s20 }
   0xd   : > { %p2384_p6 = pnand %p1922_p4, %p57_p5  ;;  %s1823_s24 = smul.u32 192, %s2312_s15 }
   0xe   : > { %s152_s28 = scalar_lea.vmem [#allocation5], %s1892_s22  ;;  %s2167_s7 = scalar_lea.hbm %s2733_s1, 36864 }
   0xf   : > { %s2392_s27 = scalar_lea.hbm %s2733_s1, %s1823_s24  ;;  %s159_s29 = sshll.u32 %s152_s28, 4  ;;  %s2394_s29 = int_to_ptr.vmem [resolvable:$true] %s159_s29 }
  0x10   : > { %s2162_s4 = scalar_lea.hbm %s2392_s27, 18432  ;;  %p2737_p8 = pneg %p2384_p6 }
  0x11   : > { %p2163_p7 = scmp.ne.s32.totalorder %s2392_s27, %s2162_s4  ;;  %p2168_p11 = scmp.lt.s32.totalorder %s2392_s27, %s2733_s1 }
  0x12   : > { %p2169_p12 = scmp.lt.s32.totalorder %s2167_s7, %s2162_s4 }
  0x13   : > { %p2165_p9 = pnand %p2737_p8, %p2163_p7 }
  0x14   : > { %p2170_p13 = por %p2169_p12, %p2168_p11 }
  0x15   : > { %p2166_p10 = pneg %p2165_p9 }
  0x17   : > { %p2171_p1 = pnand %p2170_p13, %p2166_p10 }
  0x19   : > { %2174 = shalt.err (!%p2171_p1)
}
  0x1a   : > { %s2175_s10 = scalar_lea.vmem %s2394_s29, 18432  ;;  %s2314_s11 = smov [#allocation5]  }
  0x1b   : > { %p2176_p2 = scmp.ne.s32.totalorder %s2394_s29, %s2175_s10  ;;  %s2180_s17 = sshll.u32 %s2314_s11, 4  ;;  %s2181_s17 = int_to_ptr.vmem [resolvable:$false] %s2180_s17 }
  0x1c   : > { %s2182_s18 = scalar_lea.vmem %s2181_s17, 36864  ;;  %p2183_p7 = scmp.lt.s32.totalorder %s2394_s29, %s2181_s17 }
  0x1d   : > { %p2178_p4 = pnand %p2176_p2, %p2737_p8  ;;  %p2184_p9 = scmp.lt.s32.totalorder %s2182_s18, %s2175_s10 }
  0x1f   : > { %p2179_p5 = pneg %p2178_p4  ;;  %p2185_p3 = por %p2184_p9, %p2183_p7 }
  0x21   : > { %p2186_p11 = pnand %p2185_p3, %p2179_p5 }
  0x23   : > { %2189 = shalt.err (!%p2186_p11)
}
  0x24   : > { %s2315_s20 = smov 384   ;;  %s2316_s22 = smov 192  }
  0x25   : > { %s2317_s24 = smov 12   ;;  %s2424_s25 = sadd.s32 4294967295, %s2312_s15  }
  0x26   : > { %1913 = dma.hbm_to_vmem [thread:$0]  (!%p2384_p6), %s2392_s27, 18432, %s2394_s29, %s2396_s30, %s2315_s20, %s2316_s22, %s2317_s24  }
  0x27   : > { %s1665_s26 = sadd.s32 4294967294, %s2312_s15   ;;  %p61_p3 = scmp.ne.s32.totalorder %s2304_s13, %s2300_s12 }
  0x28   : > { %p2736_p10 = scmp.eq.s32.totalorder %s2424_s25, 0  ;;  %p111_p12 = scmp.eq.s32.totalorder %s2424_s25, 1 }
  0x29   : > { %p117_p13 = scmp.eq.s32.totalorder %s1665_s26, 1  ;;  %p1666_p1 = scmp.ge.s32.totalorder %s2312_s15, 1 }
  0x2a   : > { %p2434_p2 = por %p2736_p10, %p61_p3  ;;  %p2441_p4 = por %p111_p12, %p55_p0 }
  0x2b   : > { %p2445_p5 = por %p117_p13, %p61_p3  ;;  %p124_p7 = scmp.lt.s32.totalorder %s2312_s15, 3 }
  0x2c   : > { %s2741_s28 = scalar_select %p2434_p2, 1, 0 }
  0x2d   : > { %s2742_s27 = scalar_select %p2441_p4, 1, 0 }
  0x2e   : > { %s2743_s29 = scalar_select %p2445_p5, 1, 0 }
  0x2f   : > { %p2450_p9 = pnand %p1666_p1, %p124_p7  ;;  %s2318_s5 = smov [#allocation2]  }
  0x30   : > { %s137_s6 = sshll.u32 %s2318_s5, 4  ;;  %s1893_s7 = smul.u32 3, %s150_s21  ;;  %s138_s6 = int_to_ptr.vmem [resolvable:$true] %s137_s6 }
  0x31   : > { %p1906_p11 = pneg %p2450_p9  ;;  %s1824_s8 = smul.u32 48, %s2312_s15 }
  0x32   : > { %s173_s18 = scalar_lea.vmem [#allocation7], %s1893_s7  ;;  %s2201_s21 = scalar_lea.vmem %s138_s6, 192 }
  0x33   : > { %p2461_p0 = pnand %p1906_p11, %p2736_p10  ;;  %s2468_s17 = scalar_lea.hbm %s2734_s2, %s1824_s8 }
  0x34   : > { %s181_s20 = sshll.u32 %s173_s18, 4  ;;  %p2202_p12 = scmp.ne.s32.totalorder %s138_s6, %s2201_s21  ;;  %s2470_s20 = int_to_ptr.vmem [resolvable:$true] %s181_s20 }
  0x35   : > { %p2192_p3 = pneg %p2461_p0  ;;  %p2209_p7 = scmp.lt.s32.totalorder %s138_s6, %s138_s6 }
  0x36   : > { %p2210_p11 = scmp.lt.s32.totalorder %s2201_s21, %s2201_s21 }
  0x37   : > { %p2204_p13 = pnand %p2202_p12, %p2192_p3 }
  0x38   : > { %p2211_p10 = por %p2210_p11, %p2209_p7 }
  0x39   : > { %p2205_p1 = pneg %p2204_p13 }
  0x3b   : > { %p2212_p8 = pnand %p2211_p10, %p2205_p1 }
  0x3d   : > { %2215 = shalt.err (!%p2212_p8)
}
  0x3e   : > { %1909 = dma.hbm_to_vmem [thread:$0]  (!%p2461_p0), %s2732_s0, 192, %s138_s6, [#allocation3]  }
  0x3f   : > { %s2216_s26 = scalar_lea.hbm %s2468_s17, 48  ;;  %p2746_p3 = pneg %p2384_p6 }
  0x40   : > { %p2217_p5 = scmp.ne.s32.totalorder %s2468_s17, %s2216_s26  ;;  %s2221_s8 = scalar_lea.hbm %s2734_s2, 96 }
  0x41   : > { %p2222_p8 = scmp.lt.s32.totalorder %s2468_s17, %s2734_s2  ;;  %p2223_p10 = scmp.lt.s32.totalorder %s2221_s8, %s2216_s26 }
  0x42   : > { %p2219_p12 = pnand %p2217_p5, %p2746_p3 }
  0x43   : > { %p2224_p1 = por %p2223_p10, %p2222_p8 }
  0x44   : > { %p2220_p13 = pneg %p2219_p12 }
  0x46   : > { %p2225_p7 = pnand %p2224_p1, %p2220_p13 }
  0x48   : > { %2228 = shalt.err (!%p2225_p7)
}
  0x49   : > { %s2229_s6 = scalar_lea.vmem %s2470_s20, 48  ;;  %p2747_p5 = pmov %p2746_p3 }
  0x4a   : > { %p2230_p0 = scmp.ne.s32.totalorder %s2470_s20, %s2229_s6  ;;  %s2319_s11 = smov [#allocation7]  }
  0x4b   : > { %s2234_s18 = sshll.u32 %s2319_s11, 4  ;;  %s2235_s18 = int_to_ptr.vmem [resolvable:$false] %s2234_s18 }
  0x4c   : > { %p2232_p11 = pnand %p2230_p0, %p2747_p5  ;;  %s2236_s21 = scalar_lea.vmem %s2235_s18, 96 }
  0x4d   : > { %p2237_p12 = scmp.lt.s32.totalorder %s2470_s20, %s2235_s18  ;;  %p2238_p4 = scmp.lt.s32.totalorder %s2236_s21, %s2229_s6 }
  0x4e   : > { %p2233_p3 = pneg %p2232_p11 }
  0x4f   : > { %p2239_p2 = por %p2238_p4, %p2237_p12 }
  0x51   : > { %p2240_p8 = pnand %p2239_p2, %p2233_p3 }
  0x53   : > { %2243 = shalt.err (!%p2240_p8)
}
  0x54   : > { %1916 = dma.hbm_to_vmem [thread:$0]  (!%p2384_p6), %s2468_s17, 48, %s2470_s20, %s2396_s30  }
  0x55   : > { %190 = sbr.rel (%p2450_p9) target bundleno = 495 (0x1ef), region = 32  ;;  %p2748_p13 = scmp.eq.s32.totalorder (!%p2450_p9), %s2424_s25, 0 }
  0x5a   : > { %2287 = dma.done.wait (%p2748_p13), [#allocation3], 192   ;;  %p2749_p10 = pmov %p2748_p13 }
  0x5b   : > { %s196_s22 = sand.u32 1, %s2424_s25   ;;  %s2510_s24 = sand.u32 1, %s2304_s13  }
  0x5c   : > { %2289 = vsyncadd (%p2749_p10), [#allocation3], 4294967104  ;;  %s1894_s23 = smul.u32 1152, %s2510_s24  ;;  %s197_s26 = scalar_lea.sflag [#allocation6], %s196_s22 }
  0x5d   : > { %p2750_p6 = scmp.ne.s32.totalorder %s2741_s28, 0 }
  0x5e   : > { %s2513_s5 = scalar_lea.vmem [#allocation5], %s1894_s23 }
  0x5f   : > { %2291 = dma.done.wait (%p2750_p6), %s197_s26, 18480  }
  0x60   : > { %2293 = vsyncadd (%p2750_p6), %s197_s26, 4294948816  ;;  %v1963_v0 = vld [vmem:[%s2513_s5 + $0xac] ss:$12 sps:$4 sm:$0xff]   ;;  %v1967_v2 = vld [vmem:[%s2513_s5 + $0xa8] ss:$12 sps:$4 sm:$0xff]   ;;  %v249_v38 = vlaneseq  ;;  %s1895_s30 = smul.u32 3, %s2510_s24 }
  0x61   : > { %v1965_v1 = vld [vmem:[%s2513_s5 + $0x22c] ss:$12 sps:$4 sm:$0xff]   ;;  %1259 = vmatprep.subr.bf16.mxu0 %v1963_v0  ;;  %v1968_v3 = vld [vmem:[%s2513_s5 + $0x228] ss:$12 sps:$4 sm:$0xff]   ;;  %v1973_v6 = vld [vmem:[%s2513_s5 + $0x90] ss:$12 sps:$4 sm:$0xff]  }
  0x62   : > { %1300 = vmatprep.subr.bf16.mxu1 %v1965_v1  ;;  %v1969_v4 = vld [vmem:[%s2513_s5 + $0x94] ss:$12 sps:$4 sm:$0xff]   ;;  %1260 = vmatpush1.bf16.msra.mxu0 %v1967_v2  ;;  %v1974_v7 = vld [vmem:[%s2513_s5 + $0x210] ss:$12 sps:$4 sm:$0xff]   ;;  %v1979_v10 = vld [vmem:[%s2513_s5 + $0x78] ss:$12 sps:$4 sm:$0xff]  }
  0x63   : > { %1301 = vmatpush1.bf16.msra.mxu1 %v1968_v3  ;;  %v1971_v5 = vld [vmem:[%s2513_s5 + $0x214] ss:$12 sps:$4 sm:$0xff]   ;;  %1261 = vmatprep.subr.bf16.mxu0 %v1969_v4  ;;  %v1975_v8 = vld [vmem:[%s2513_s5 + $0x7c] ss:$12 sps:$4 sm:$0xff]   ;;  %v1980_v11 = vld [vmem:[%s2513_s5 + $0x1f8] ss:$12 sps:$4 sm:$0xff]  }
  0x64   : > { %1302 = vmatprep.subr.bf16.mxu1 %v1971_v5  ;;  %v1977_v9 = vld [vmem:[%s2513_s5 + $0x1fc] ss:$12 sps:$4 sm:$0xff]   ;;  %v1981_v12 = vld [vmem:[%s2513_s5 + $0x64] ss:$12 sps:$4 sm:$0xff]   ;;  %v1985_v14 = vld [vmem:[%s2513_s5 + $0x60] ss:$12 sps:$4 sm:$0xff]  }
  0x65   : > { %v1983_v13 = vld [vmem:[%s2513_s5 + $0x1e4] ss:$12 sps:$4 sm:$0xff]   ;;  %v1986_v15 = vld [vmem:[%s2513_s5 + $0x1e0] ss:$12 sps:$4 sm:$0xff]   ;;  %v1991_v18 = vld [vmem:[%s2513_s5 + $0x48] ss:$12 sps:$4 sm:$0xff]  }
  0x66   : > { %1262 = vmatpush1.bf16.msra.mxu0 %v1973_v6  ;;  %v1987_v16 = vld [vmem:[%s2513_s5 + $0x4c] ss:$12 sps:$4 sm:$0xff]   ;;  %v1992_v19 = vld [vmem:[%s2513_s5 + $0x1c8] ss:$12 sps:$4 sm:$0xff]   ;;  %v1997_v22 = vld [vmem:[%s2513_s5 + $0x30] ss:$12 sps:$4 sm:$0xff]  }
  0x67   : > { %1303 = vmatpush1.bf16.msra.mxu1 %v1974_v7  ;;  %1263 = vmatprep.subr.bf16.mxu0 %v1975_v8  ;;  %v1989_v17 = vld [vmem:[%s2513_s5 + $0x1cc] ss:$12 sps:$4 sm:$0xff]   ;;  %v1993_v20 = vld [vmem:[%s2513_s5 + $0x34] ss:$12 sps:$4 sm:$0xff]   ;;  %v1998_v23 = vld [vmem:[%s2513_s5 + $0x1b0] ss:$12 sps:$4 sm:$0xff]  }
  0x68   : > { %1304 = vmatprep.subr.bf16.mxu1 %v1977_v9  ;;  %v1995_v21 = vld [vmem:[%s2513_s5 + $0x1b4] ss:$12 sps:$4 sm:$0xff]   ;;  %v1999_v24 = vld [vmem:[%s2513_s5 + $0x1c] ss:$12 sps:$4 sm:$0xff]   ;;  %v2003_v26 = vld [vmem:[%s2513_s5 + $0x18] ss:$12 sps:$4 sm:$0xff]  }
  0x69   : > { %v2001_v25 = vld [vmem:[%s2513_s5 + $0x19c] ss:$12 sps:$4 sm:$0xff]   ;;  %v2004_v27 = vld [vmem:[%s2513_s5 + $0x198] ss:$12 sps:$4 sm:$0xff]   ;;  %v2009_v30 = vld [vmem:[%s2513_s5] ss:$12 sps:$4 sm:$0xff]  }
  0x6a   : > { %1264 = vmatpush1.bf16.msra.mxu0 %v1979_v10  ;;  %v2005_v28 = vld [vmem:[%s2513_s5 + $0x4] ss:$12 sps:$4 sm:$0xff]   ;;  %v2010_v31 = vld [vmem:[%s2513_s5 + $0x180] ss:$12 sps:$4 sm:$0xff]   ;;  %v2015_v34 = vld [vmem:[%s2513_s5 + $0x168] ss:$12 sps:$4 sm:$0xff]  }
  0x6b   : > { %1305 = vmatpush1.bf16.msra.mxu1 %v1980_v11  ;;  %1265 = vmatprep.subr.bf16.mxu0 %v1981_v12  ;;  %v2007_v29 = vld [vmem:[%s2513_s5 + $0x184] ss:$12 sps:$4 sm:$0xff]   ;;  %v2011_v32 = vld [vmem:[%s2513_s5 + $0x16c] ss:$12 sps:$4 sm:$0xff]   ;;  %v2016_v35 = vld [vmem:[%s2513_s5 + $0x2e8] ss:$12 sps:$4 sm:$0xff]  }
  0x6c   : > { %1306 = vmatprep.subr.bf16.mxu1 %v1983_v13  ;;  %v2013_v33 = vld [vmem:[%s2513_s5 + $0x2ec] ss:$12 sps:$4 sm:$0xff]   ;;  %v2320_v36 = vmov 1983009808   ;;  %v2017_v39 = vld [vmem:[%s2513_s5 + $0x154] ss:$12 sps:$4 sm:$0xff]  }
  0x6d   : > { %v247_v37 = vunpack.c.l.s4 %v2320_v36  ;;  %v2019_v40 = vld [vmem:[%s2513_s5 + $0x2d4] ss:$12 sps:$4 sm:$0xff]   ;;  %v2021_v41 = vld [vmem:[%s2513_s5 + $0x150] ss:$12 sps:$4 sm:$0xff]   ;;  %v2558_v43 = vshrl.u32 %v249_v38, 7  ;;  %s209_s28 = scalar_lea.vmem [#allocation7], %s1895_s30 }
  0x6e   : > { %1266 = vmatpush1.bf16.msra.mxu0 %v1985_v14  ;;  %v2022_v44 = vld [vmem:[%s2513_s5 + $0x2d0] ss:$12 sps:$4 sm:$0xff]   ;;  %v2027_v47 = vld [vmem:[%s2513_s5 + $0x138] ss:$12 sps:$4 sm:$0xff]   ;;  %v2033_v52 = vld [vmem:[%s2513_s5 + $0x120] ss:$12 sps:$4 sm:$0xff]  }
  0x6f   : > { %1307 = vmatpush1.bf16.msra.mxu1 %v1986_v15  ;;  %1267 = vmatprep.subr.bf16.mxu0 %v1987_v16  ;;  %v248_v42 = vunpack.c.0.s8 %v247_v37  ;;  %v2023_v45 = vld [vmem:[%s2513_s5 + $0x13c] ss:$12 sps:$4 sm:$0xff]   ;;  %v2028_v48 = vld [vmem:[%s2513_s5 + $0x2b8] ss:$12 sps:$4 sm:$0xff]   ;;  %v2034_v54 = vld [vmem:[%s2513_s5 + $0x2a0] ss:$12 sps:$4 sm:$0xff]  }
  0x70   : > { %1308 = vmatprep.subr.bf16.mxu1 %v1989_v17  ;;  %v2025_v46 = vld [vmem:[%s2513_s5 + $0x2bc] ss:$12 sps:$4 sm:$0xff]   ;;  %v2029_v50 = vld [vmem:[%s2513_s5 + $0x124] ss:$12 sps:$4 sm:$0xff]   ;;  %v241_v53 = vld [vmem:[#allocation2] sm:$0xff]  ;;  %s1825_s4 = smul.u32 48, %s2424_s25 }
  0x71   : > { %v251_v49 = vsub.s32 %v248_v42, %v2558_v43  ;;  %v2031_v51 = vld [vmem:[%s2513_s5 + $0x2a4] ss:$12 sps:$4 sm:$0xff]   ;;  %v245_v56 = vcombine.high %v241_v53, %v241_v53  ;;  %v2035_v57 = vld [vmem:[%s2513_s5 + $0x10c] ss:$12 sps:$4 sm:$0xff]   ;;  %v2039_v61 = vld [vmem:[%s2513_s5 + $0x108] ss:$12 sps:$4 sm:$0xff]  }
  0x72   : > { %1268 = vmatpush1.bf16.msra.mxu0 %v1991_v18  ;;  %v2037_v58 = vld [vmem:[%s2513_s5 + $0x28c] ss:$12 sps:$4 sm:$0xff]   ;;  %v2040_v62 = vld [vmem:[%s2513_s5 + $0x288] ss:$12 sps:$4 sm:$0xff]   ;;  %v2045_v4 = vld [vmem:[%s2513_s5 + $0xf0] ss:$12 sps:$4 sm:$0xff]   ;;  %s1561_s10 = scalar_lea.hbm %s2735_s3, %s1825_s4 }
  0x73   : > { %1309 = vmatpush1.bf16.msra.mxu1 %v1992_v19  ;;  %1269 = vmatprep.subr.bf16.mxu0 %v1993_v20  ;;  %v252_v55 = vrot.slane %v241_v53, %v251_v49  ;;  %v259_v60 = vrot.slane %v245_v56, %v251_v49  ;;  %v2041_v1 = vld [vmem:[%s2513_s5 + $0xf4] ss:$12 sps:$4 sm:$0xff]   ;;  %v2046_v5 = vld [vmem:[%s2513_s5 + $0x270] ss:$12 sps:$4 sm:$0xff]   ;;  %v2051_v8 = vld [vmem:[%s2513_s5 + $0xd8] ss:$12 sps:$4 sm:$0xff]  }
  0x74   : > { %1310 = vmatprep.subr.bf16.mxu1 %v1995_v21  ;;  %v2043_v2 = vld [vmem:[%s2513_s5 + $0x274] ss:$12 sps:$4 sm:$0xff]   ;;  %v2047_v6 = vld [vmem:[%s2513_s5 + $0xdc] ss:$12 sps:$4 sm:$0xff]   ;;  %v2052_v9 = vld [vmem:[%s2513_s5 + $0x258] ss:$12 sps:$4 sm:$0xff]  }
  0x75   : > { %v260_v59 = vcombine.high %v252_v55, %v252_v55  ;;  %v261_v0 = vcombine.high %v259_v60, %v259_v60  ;;  %v2049_v7 = vld [vmem:[%s2513_s5 + $0x25c] ss:$12 sps:$4 sm:$0xff]   ;;  %v2053_v10 = vld [vmem:[%s2513_s5 + $0xc4] ss:$12 sps:$4 sm:$0xff]   ;;  %v2057_v12 = vld [vmem:[%s2513_s5 + $0xc0] ss:$12 sps:$4 sm:$0xff]   ;;  %v2592_v17 = vpack.c.bf16 %v252_v55, %v252_v55  ;;  %v2594_v18 = vpack.c.bf16 %v259_v60, %v259_v60 }
  0x76   : > { %1270 = vmatpush1.bf16.msra.mxu0 %v1997_v22  ;;  %v2055_v11 = vld [vmem:[%s2513_s5 + $0x244] ss:$12 sps:$4 sm:$0xff]   ;;  %v2058_v13 = vld [vmem:[%s2513_s5 + $0x240] ss:$12 sps:$4 sm:$0xff]   ;;  %v2060_v16 = vld [vmem:[%s2513_s5 + $0x3a8] ss:$12 sps:$4 sm:$0xff]  }
  0x77   : > { %1311 = vmatpush1.bf16.msra.mxu1 %v1998_v23  ;;  %1271 = vmatprep.subr.bf16.mxu0 %v1999_v24  ;;  %v277_v63 = vpack.c.bf16 %v260_v59, %v260_v59  ;;  %v2576_v3 = vpack.c.bf16 %v261_v0, %v261_v0  ;;  %v2062_v14 = vld [vmem:[%s2513_s5 + $0x3ac] ss:$12 sps:$4 sm:$0xff]   ;;  %v2063_v15 = vld [vmem:[%s2513_s5 + $0x170] ss:$12 sps:$4 sm:$0xff]   ;;  %v2067_v20 = vld [vmem:[%s2513_s5 + $0x394] ss:$12 sps:$4 sm:$0xff]  }
  0x78   : > { %1312 = vmatprep.subr.bf16.mxu1 %v2001_v25  ;;  %v2064_v19 = vld [vmem:[%s2513_s5 + $0xb0] ss:$12 sps:$4 sm:$0xff]   ;;  %v2068_v21 = vld [vmem:[%s2513_s5 + $0x158] ss:$12 sps:$4 sm:$0xff]   ;;  %v2073_v25 = vld [vmem:[%s2513_s5 + $0x140] ss:$12 sps:$4 sm:$0xff]  }
  0x79   : > { %1291 = vmatprep.mubr.bf16.mxu0 %v277_v63  ;;  %1332 = vmatprep.mubr.bf16.mxu1 %v2576_v3  ;;  %v2065_v22 = vld [vmem:[%s2513_s5 + $0x390] ss:$12 sps:$4 sm:$0xff]   ;;  %v2069_v23 = vld [vmem:[%s2513_s5 + $0x98] ss:$12 sps:$4 sm:$0xff]   ;;  %v2087_v36 = vld [vmem:[%s2513_s5 + $0x334] ss:$12 sps:$4 sm:$0xff]  }
  0x7a   : > { %1272 = vmatpush1.bf16.msra.mxu0 %v2003_v26  ;;  %v2072_v24 = vld [vmem:[%s2513_s5 + $0x37c] ss:$12 sps:$4 sm:$0xff]   ;;  %v2070_v26 = vld [vmem:[%s2513_s5 + $0x378] ss:$12 sps:$4 sm:$0xff]   ;;  %v2107_v53 = vld [vmem:[%s2513_s5 + $0x454] ss:$12 sps:$4 sm:$0xff]  }
  0x7b   : > { %1313 = vmatpush1.bf16.msra.mxu1 %v2004_v27  ;;  %1273 = vmatprep.subr.bf16.mxu0 %v2005_v28  ;;  %v2074_v27 = vld [vmem:[%s2513_s5 + $0x80] ss:$12 sps:$4 sm:$0xff]   ;;  %v2077_v28 = vld [vmem:[%s2513_s5 + $0x364] ss:$12 sps:$4 sm:$0xff]   ;;  %v2112_v60 = vld [vmem:[%s2513_s5 + $0x43c] ss:$12 sps:$4 sm:$0xff]  }
  0x7c   : > { %1314 = vmatprep.subr.bf16.mxu1 %v2007_v29  ;;  %v2078_v29 = vld [vmem:[%s2513_s5 + $0x128] ss:$12 sps:$4 sm:$0xff]   ;;  %v2088_v37 = vld [vmem:[%s2513_s5 + $0xf8] ss:$12 sps:$4 sm:$0xff]   ;;  %v2085_v38 = vld [vmem:[%s2513_s5 + $0x330] ss:$12 sps:$4 sm:$0xff]  }
  0x7d   : > { %v2090_v42 = vld [vmem:[%s2513_s5 + $0x318] ss:$12 sps:$4 sm:$0xff]   ;;  %s236_s17 = scalar_lea.vmem [#allocation8], %s1895_s30  ;;  %s1549_s9 = scalar_lea.sflag [#allocation4], %s2510_s24 }
  0x7e   : > { %1274 = vmatpush1.bf16.msra.mxu0 %v2009_v30  ;;  %v2075_v30 = vld [vmem:[%s2513_s5 + $0x360] ss:$12 sps:$4 sm:$0xff]   ;;  %v2108_v55 = vld [vmem:[%s2513_s5 + $0x2d8] ss:$12 sps:$4 sm:$0xff]   ;;  %s1563_s20 = sshll.u32 %s236_s17, 4  ;;  %p2751_p4 = scmp.ne.s32.totalorder %s2742_s27, 0  ;;  %s1564_s20 = int_to_ptr.vmem [resolvable:$true] %s1563_s20 }
  0x7f   : > { %1315 = vmatpush1.bf16.msra.mxu1 %v2010_v31  ;;  %1275 = vmatprep.subr.bf16.mxu0 %v2011_v32  ;;  %v2079_v31 = vld [vmem:[%s2513_s5 + $0x68] ss:$12 sps:$4 sm:$0xff]   ;;  %v2082_v32 = vld [vmem:[%s2513_s5 + $0x34c] ss:$12 sps:$4 sm:$0xff]   ;;  %v2117_v0 = vld [vmem:[%s2513_s5 + $0x424] ss:$12 sps:$4 sm:$0xff]  }
  0x80   : > { %1316 = vmatprep.subr.bf16.mxu1 %v2013_v33  ;;  %v2083_v33 = vld [vmem:[%s2513_s5 + $0x110] ss:$12 sps:$4 sm:$0xff]   ;;  %v2102_v49 = vld [vmem:[%s2513_s5 + $0x46c] ss:$12 sps:$4 sm:$0xff]   ;;  %s2244_s6 = scalar_lea.vmem %s1564_s20, 48  ;;  %s2322_s11 = smov [#allocation8]  }
  0x81   : > { %p2245_p2 = scmp.ne.s32.totalorder %s1564_s20, %s2244_s6  ;;  %s2248_s25 = sshll.u32 %s2322_s11, 4  ;;  %s2249_s25 = int_to_ptr.vmem [resolvable:$false] %s2248_s25 }
  0x82   : > { %1276 = vmatpush2.bf16.msra.mxu0 %v2015_v34  ;;  %v2080_v34 = vld [vmem:[%s2513_s5 + $0x348] ss:$12 sps:$4 sm:$0xff]   ;;  %s2250_s18 = scalar_lea.vmem %s2249_s25, 96  ;;  %p2251_p7 = scmp.lt.s32.totalorder %s1564_s20, %s2249_s25 }
  0x83   : > { %1317 = vmatpush2.bf16.msra.mxu1 %v2016_v35  ;;  %1277 = vmatprep.subr.bf16.mxu0 %v2017_v39  ;;  %v2084_v35 = vld [vmem:[%s2513_s5 + $0x50] ss:$12 sps:$4 sm:$0xff]   ;;  %v2089_v39 = vld [vmem:[%s2513_s5 + $0x38] ss:$12 sps:$4 sm:$0xff]   ;;  %p2246_p9 = pnand %p2245_p2, %p2751_p4  ;;  %p2252_p0 = scmp.lt.s32.totalorder %s2250_s18, %s2244_s6 }
  0x84   : > { %1318 = vmatprep.subr.bf16.mxu1 %v2019_v40  ;;  %v2092_v40 = vld [vmem:[%s2513_s5 + $0x31c] ss:$12 sps:$4 sm:$0xff]  }
  0x85   : > { %p2247_p1 = pneg %p2246_p9  ;;  %p2253_p5 = por %p2252_p0, %p2251_p7 }
  0x86   : > { %1278 = vmatpush2.bf16.msra.mxu0 %v2021_v41  ;;  %v2093_v41 = vld [vmem:[%s2513_s5 + $0xe0] ss:$12 sps:$4 sm:$0xff]  }
  0x87   : > { %1319 = vmatpush2.bf16.msra.mxu1 %v2022_v44  ;;  %1279 = vmatprep.subr.bf16.mxu0 %v2023_v45  ;;  %v2094_v44 = vld [vmem:[%s2513_s5 + $0x20] ss:$12 sps:$4 sm:$0xff]   ;;  %v2097_v45 = vld [vmem:[%s2513_s5 + $0x304] ss:$12 sps:$4 sm:$0xff]   ;;  %p2254_p11 = pnand %p2253_p5, %p2247_p1 }
  0x88   : > { %1320 = vmatprep.subr.bf16.mxu1 %v2025_v46  ;;  %v2098_v46 = vld [vmem:[%s2513_s5 + $0xc8] ss:$12 sps:$4 sm:$0xff]  }
  0x8a   : > { %1280 = vmatpush2.bf16.msra.mxu0 %v2027_v47  ;;  %v2095_v47 = vld [vmem:[%s2513_s5 + $0x300] ss:$12 sps:$4 sm:$0xff]  }
  0x8b   : > { %1321 = vmatpush2.bf16.msra.mxu1 %v2028_v48  ;;  %1281 = vmatprep.subr.bf16.mxu0 %v2029_v50  ;;  %v2099_v48 = vld [vmem:[%s2513_s5 + $0x8] ss:$12 sps:$4 sm:$0xff]   ;;  %v2103_v50 = vld [vmem:[%s2513_s5 + $0x2f0] ss:$12 sps:$4 sm:$0xff]  }
  0x8c   : > { %1322 = vmatprep.subr.bf16.mxu1 %v2031_v51  ;;  %v2100_v51 = vld [vmem:[%s2513_s5 + $0x468] ss:$12 sps:$4 sm:$0xff]  }
  0x8e   : > { %1282 = vmatpush2.bf16.msra.mxu0 %v2033_v52  ;;  %v2104_v52 = vld [vmem:[%s2513_s5 + $0x230] ss:$12 sps:$4 sm:$0xff]  }
  0x8f   : > { %1323 = vmatpush2.bf16.msra.mxu1 %v2034_v54  ;;  %1283 = vmatprep.subr.bf16.mxu0 %v2035_v57  ;;  %v2632_v54 = vld.sshfl [vmem:[#allocation2 + $0x8] sm:$0x33 pattern:$0x76325410] }
  0x90   : > { %1324 = vmatprep.subr.bf16.mxu1 %v2037_v58  ;;  %v269_v56 = vcombine.high %v2632_v54, %v2632_v54  ;;  %v2105_v57 = vld [vmem:[%s2513_s5 + $0x450] ss:$12 sps:$4 sm:$0xff]   ;;  %v2109_v58 = vld [vmem:[%s2513_s5 + $0x218] ss:$12 sps:$4 sm:$0xff]  }
  0x92   : > { %1284 = vmatpush2.bf16.msra.mxu0 %v2039_v61  ;;  %v2640_v59 = vpack.c.bf16 %v269_v56, %v269_v56  ;;  %v2113_v61 = vld [vmem:[%s2513_s5 + $0x2c0] ss:$12 sps:$4 sm:$0xff]  }
  0x93   : > { %1325 = vmatpush2.bf16.msra.mxu1 %v2040_v62  ;;  %1285 = vmatprep.subr.bf16.mxu0 %v2041_v1  ;;  %v2110_v62 = vld [vmem:[%s2513_s5 + $0x438] ss:$12 sps:$4 sm:$0xff]   ;;  %v2118_v1 = vld [vmem:[%s2513_s5 + $0x2a8] ss:$12 sps:$4 sm:$0xff]  }
  0x94   : > { %1326 = vmatprep.subr.bf16.mxu1 %v2043_v2  ;;  %v2115_v2 = vld [vmem:[%s2513_s5 + $0x420] ss:$12 sps:$4 sm:$0xff]  }
  0x96   : > { %1286 = vmatpush2.bf16.msra.mxu0 %v2045_v4  ;;  %v2119_v4 = vld [vmem:[%s2513_s5 + $0x1e8] ss:$12 sps:$4 sm:$0xff]  }
  0x97   : > { %1327 = vmatpush2.bf16.msra.mxu1 %v2046_v5  ;;  %1287 = vmatprep.subr.bf16.mxu0 %v2047_v6  ;;  %v2122_v5 = vld [vmem:[%s2513_s5 + $0x40c] ss:$12 sps:$4 sm:$0xff]   ;;  %v2120_v6 = vld [vmem:[%s2513_s5 + $0x408] ss:$12 sps:$4 sm:$0xff]  }
  0x98   : > { %1328 = vmatprep.subr.bf16.mxu1 %v2049_v7  ;;  %v2124_v7 = vld [vmem:[%s2513_s5 + $0x1d0] ss:$12 sps:$4 sm:$0xff]  }
  0x9a   : > { %1288 = vmatpush2.bf16.msra.mxu0 %v2051_v8  ;;  %v2127_v8 = vld [vmem:[%s2513_s5 + $0x3f4] ss:$12 sps:$4 sm:$0xff]  }
  0x9b   : > { %1329 = vmatpush2.bf16.msra.mxu1 %v2052_v9  ;;  %1289 = vmatprep.subr.bf16.mxu0 %v2053_v10  ;;  %v2128_v9 = vld [vmem:[%s2513_s5 + $0x278] ss:$12 sps:$4 sm:$0xff]   ;;  %v2125_v10 = vld [vmem:[%s2513_s5 + $0x3f0] ss:$12 sps:$4 sm:$0xff]  }
  0x9c   : > { %1330 = vmatprep.subr.bf16.mxu1 %v2055_v11  ;;  %v2129_v11 = vld [vmem:[%s2513_s5 + $0x1b8] ss:$12 sps:$4 sm:$0xff]  }
  0x9e   : > { %1290 = vmatpush2.bf16.msra.mxu0 %v2057_v12  ;;  %v2132_v12 = vld [vmem:[%s2513_s5 + $0x3dc] ss:$12 sps:$4 sm:$0xff]  }
  0x9f   : > { %1331 = vmatpush2.bf16.msra.mxu1 %v2058_v13  ;;  %1341 = vmatprep.subr.bf16.mxu0 %v2062_v14  ;;  %v2133_v13 = vld [vmem:[%s2513_s5 + $0x260] ss:$12 sps:$4 sm:$0xff]   ;;  %v2130_v14 = vld [vmem:[%s2513_s5 + $0x3d8] ss:$12 sps:$4 sm:$0xff]  }
  0xa0   : > { %1826 = vmatprep.subr.bf16.mxu1 %v2063_v15  ;;  %v2134_v15 = vld [vmem:[%s2513_s5 + $0x1a0] ss:$12 sps:$4 sm:$0xff]  }
  0xa1   : > { %1292 = vmatmul.mubr.bf16.vlgmr.msra.gmra.mxu0 %v2592_v17 }
  0xa2   : > { %1333 = vmatmul.mubr.bf16.vlgmr.msra.gmra.mxu1 %v2594_v18  ;;  %1342 = vmatpush1.bf16.msra.mxu0 %v2060_v16  ;;  %v2137_v16 = vld [vmem:[%s2513_s5 + $0x3c4] ss:$12 sps:$4 sm:$0xff]  }
  0xa3   : > { %1827 = vmatpush3.bf16.msra.mxu1 %v2064_v19  ;;  %1343 = vmatprep.subr.bf16.mxu0 %v2067_v20  ;;  %v2135_v19 = vld [vmem:[%s2513_s5 + $0x3c0] ss:$12 sps:$4 sm:$0xff]   ;;  %v2139_v20 = vld [vmem:[%s2513_s5 + $0x188] ss:$12 sps:$4 sm:$0xff]  }
  0xa4   : > { %1828 = vmatprep.subr.bf16.mxu1 %v2068_v21  ;;  %1414 = vmatprep.mubr.bf16.mxu1 %v277_v63  ;;  %v2114_v63 = vld [vmem:[%s2513_s5 + $0x200] ss:$12 sps:$4 sm:$0xff]   ;;  %v2140_v21 = vld [vmem:[%s2513_s5 + $0x470] ss:$12 sps:$4 sm:$0xff]  }
  0xa5   : > { %1373 = vmatprep.mubr.bf16.mxu0 %v2640_v59 }
  0xa6   : > { %1344 = vmatpush1.bf16.msra.mxu0 %v2065_v22  ;;  %v280_v22 = vpack.c.bf16 %v2632_v54, %v2632_v54 }
  0xa7   : > { %1829 = vmatpush3.bf16.msra.mxu1 %v2069_v23  ;;  %1345 = vmatprep.subr.bf16.mxu0 %v2072_v24  ;;  %v2141_v23 = vld [vmem:[%s2513_s5 + $0x3b0] ss:$12 sps:$4 sm:$0xff]   ;;  %v2142_v24 = vld [vmem:[%s2513_s5 + $0x458] ss:$12 sps:$4 sm:$0xff]  }
  0xa8   : > { %1830 = vmatprep.subr.bf16.mxu1 %v2073_v25  ;;  %v2143_v25 = vld [vmem:[%s2513_s5 + $0x398] ss:$12 sps:$4 sm:$0xff]  }
  0xaa   : > { %1346 = vmatpush1.bf16.msra.mxu0 %v2070_v26  ;;  %v2144_v26 = vld [vmem:[%s2513_s5 + $0x440] ss:$12 sps:$4 sm:$0xff]  }
  0xab   : > { %1831 = vmatpush3.bf16.msra.mxu1 %v2074_v27  ;;  %1347 = vmatprep.subr.bf16.mxu0 %v2077_v28  ;;  %v2145_v27 = vld [vmem:[%s2513_s5 + $0x380] ss:$12 sps:$4 sm:$0xff]   ;;  %v2146_v28 = vld [vmem:[%s2513_s5 + $0x428] ss:$12 sps:$4 sm:$0xff]  }
  0xac   : > { %1832 = vmatprep.subr.bf16.mxu1 %v2078_v29  ;;  %v2147_v29 = vld [vmem:[%s2513_s5 + $0x368] ss:$12 sps:$4 sm:$0xff]  }
  0xae   : > { %1348 = vmatpush1.bf16.msra.mxu0 %v2075_v30  ;;  %v2149_v30 = vld [vmem:[%s2513_s5 + $0x350] ss:$12 sps:$4 sm:$0xff]  }
  0xaf   : > { %1833 = vmatpush3.bf16.msra.mxu1 %v2079_v31  ;;  %1349 = vmatprep.subr.bf16.mxu0 %v2082_v32  ;;  %v2150_v31 = vld [vmem:[%s2513_s5 + $0x3f8] ss:$12 sps:$4 sm:$0xff]  }
  0xb0   : > { %1834 = vmatprep.subr.bf16.mxu1 %v2083_v33  ;;  %v2151_v32 = vld [vmem:[%s2513_s5 + $0x338] ss:$12 sps:$4 sm:$0xff]   ;;  %v2152_v33 = vld [vmem:[%s2513_s5 + $0x3e0] ss:$12 sps:$4 sm:$0xff]  }
  0xb2   : > { %1350 = vmatpush1.bf16.msra.mxu0 %v2080_v34  ;;  %v2153_v34 = vld [vmem:[%s2513_s5 + $0x320] ss:$12 sps:$4 sm:$0xff]  }
  0xb3   : > { %1835 = vmatpush3.bf16.msra.mxu1 %v2084_v35  ;;  %1351 = vmatprep.subr.bf16.mxu0 %v2087_v36  ;;  %v2154_v35 = vld [vmem:[%s2513_s5 + $0x3c8] ss:$12 sps:$4 sm:$0xff]  }
  0xb4   : > { %1836 = vmatprep.subr.bf16.mxu1 %v2088_v37  ;;  %v2155_v36 = vld [vmem:[%s2513_s5 + $0x308] ss:$12 sps:$4 sm:$0xff]   ;;  %v478_v37 = vsub.s32 0, %v2558_v43 }
  0xb6   : > { %1352 = vmatpush1.bf16.msra.mxu0 %v2085_v38  ;;  %v474_v38 = vld [vmem:[%s209_s28] sm:$0x7] }
  0xb7   : > { %1837 = vmatpush3.bf16.msra.mxu1 %v2089_v39  ;;  %1353 = vmatprep.subr.bf16.mxu0 %v2092_v40  ;;  %v482_v39 = vsub.s32 1, %v2558_v43  ;;  %v479_v40 = vrot.slane %v474_v38, %v478_v37 }
  0xb8   : > { %1838 = vmatprep.subr.bf16.mxu1 %v2093_v41 }
  0xb9   : > { %v483_v41 = vrot.slane %v474_v38, %v482_v39 }
  0xba   : > { %1354 = vmatpush1.bf16.msra.mxu0 %v2090_v42 }
  0xbb   : > { %1839 = vmatpush3.bf16.msra.mxu1 %v2094_v44  ;;  %1355 = vmatprep.subr.bf16.mxu0 %v2097_v45 }
  0xbc   : > { %1840 = vmatprep.subr.bf16.mxu1 %v2098_v46 }
  0xbe   : > { %1356 = vmatpush1.bf16.msra.mxu0 %v2095_v47 }
  0xbf   : > { %1841 = vmatpush3.bf16.msra.mxu1 %v2099_v48  ;;  %1357 = vmatprep.subr.bf16.mxu0 %v2102_v49 }
  0xc0   : > { %1848 = vmatprep.subr.bf16.mxu1 %v2103_v50 }
  0xc2   : > { %1415 = vmatmul.mubr.bf16.vlgmr.msra.gmra.mxu1 %v2592_v17  ;;  %1358 = vmatpush2.bf16.msra.mxu0 %v2100_v51  ;;  %v2138_v17 = vld [vmem:[%s2513_s5 + $0x248] ss:$12 sps:$4 sm:$0xff]  }
  0xc3   : > { %1849 = vmatpush3.bf16.msra.mxu1 %v2104_v52  ;;  %1359 = vmatprep.subr.bf16.mxu0 %v2107_v53 }
  0xc4   : > { %1850 = vmatprep.subr.bf16.mxu1 %v2108_v55  ;;  %1454 = vmatprep.mubr.bf16.mxu1 %v2576_v3  ;;  %v2123_v3 = vld [vmem:[%s2513_s5 + $0x290] ss:$12 sps:$4 sm:$0xff]  }
  0xc6   : > { %1360 = vmatpush2.bf16.msra.mxu0 %v2105_v57 }
  0xc7   : > { %1851 = vmatpush3.bf16.msra.mxu1 %v2109_v58  ;;  %1361 = vmatprep.subr.bf16.mxu0 %v2112_v60 }
  0xc8   : > { %1852 = vmatprep.subr.bf16.mxu1 %v2113_v61 }
  0xca   : > { %1362 = vmatpush2.bf16.msra.mxu0 %v2110_v62 }
  0xcb   : > { %1853 = vmatpush3.bf16.msra.mxu1 %v2114_v63  ;;  %1363 = vmatprep.subr.bf16.mxu0 %v2117_v0 }
  0xcc   : > { %1854 = vmatprep.subr.bf16.mxu1 %v2118_v1 }
  0xce   : > { %1364 = vmatpush2.bf16.msra.mxu0 %v2115_v2 }
  0xcf   : > { %1855 = vmatpush3.bf16.msra.mxu1 %v2119_v4  ;;  %1365 = vmatprep.subr.bf16.mxu0 %v2122_v5 }
  0xd0   : > { %1856 = vmatprep.subr.bf16.mxu1 %v2123_v3 }
  0xd2   : > { %1366 = vmatpush2.bf16.msra.mxu0 %v2120_v6 }
  0xd3   : > { %1857 = vmatpush3.bf16.msra.mxu1 %v2124_v7  ;;  %1367 = vmatprep.subr.bf16.mxu0 %v2127_v8 }
  0xd4   : > { %1858 = vmatprep.subr.bf16.mxu1 %v2128_v9 }
  0xd6   : > { %1368 = vmatpush2.bf16.msra.mxu0 %v2125_v10 }
  0xd7   : > { %1859 = vmatpush3.bf16.msra.mxu1 %v2129_v11  ;;  %1369 = vmatprep.subr.bf16.mxu0 %v2132_v12 }
  0xd8   : > { %1860 = vmatprep.subr.bf16.mxu1 %v2133_v13  ;;  %v486_v13 = vsub.s32 2, %v2558_v43 }
  0xda   : > { %1370 = vmatpush2.bf16.msra.mxu0 %v2130_v14 }
  0xdb   : > { %1861 = vmatpush3.bf16.msra.mxu1 %v2134_v15  ;;  %1371 = vmatprep.subr.bf16.mxu0 %v2137_v16 }
  0xdc   : > { %1862 = vmatprep.subr.bf16.mxu1 %v2138_v17  ;;  %v487_v17 = vrot.slane %v474_v38, %v486_v13 }
  0xde   : > { %1372 = vmatpush2.bf16.msra.mxu0 %v2135_v19 }
  0xdf   : > { %1863 = vmatpush3.bf16.msra.mxu1 %v2139_v20  ;;  %1870 = vmatprep.subr.bf16.mxu0 %v2140_v21 }
  0xe1   : > { %1374 = vmatmul.mubr.bf16.vlgmr.msra.gmra.mxu0 %v280_v22 }
  0xe2   : > { %1455 = vmatmul.mubr.bf16.vlgmr.msra.gmra.mxu1 %v2594_v18  ;;  %1871 = vmatpush3.bf16.msra.mxu0 %v2141_v23  ;;  %v2148_v18 = vld [vmem:[%s2513_s5 + $0x410] ss:$12 sps:$4 sm:$0xff]  }
  0xe3   : > { %1494 = vmatprep.mubr.bf16.mxu0 %v2640_v59  ;;  %1872 = vmatprep.subr.bf16.mxu0 %v2142_v24 }
  0xe6   : > { %1873 = vmatpush3.bf16.msra.mxu0 %v2143_v25 }
  0xe7   : > { %1874 = vmatprep.subr.bf16.mxu0 %v2144_v26 }
  0xea   : > { %1875 = vmatpush3.bf16.msra.mxu0 %v2145_v27 }
  0xeb   : > { %1876 = vmatprep.subr.bf16.mxu0 %v2146_v28 }
  0xee   : > { %1877 = vmatpush3.bf16.msra.mxu0 %v2147_v29 }
  0xef   : > { %1878 = vmatprep.subr.bf16.mxu0 %v2148_v18  ;;  %v2321_v18 = vmov 1966171168  }
  0xf2   : > { %1879 = vmatpush3.bf16.msra.mxu0 %v2149_v30  ;;  %v1525_v30 = vunpack.c.l.s4 %v2321_v18 }
  0xf3   : > { %1880 = vmatprep.subr.bf16.mxu0 %v2150_v31 }
  0xf4   : > { %v1526_v31 = vunpack.c.0.s8 %v1525_v30 }
  0xf6   : > { %1881 = vmatpush3.bf16.msra.mxu0 %v2151_v32 }
  0xf7   : > { %1882 = vmatprep.subr.bf16.mxu0 %v2152_v33 }
  0xfa   : > { %1883 = vmatpush3.bf16.msra.mxu0 %v2153_v34 }
  0xfb   : > { %1884 = vmatprep.subr.bf16.mxu0 %v2154_v35  ;;  %v1529_v35 = vsub.s32 %v1526_v31, %v2558_v43 }
  0xfe   : > { %1885 = vmatpush3.bf16.msra.mxu0 %v2155_v36 }
 0x101   : > { %1495 = vmatmul.mubr.bf16.vlgmr.msra.gmra.mxu0 %v280_v22 }
 0x161   : > { %v1293_v42 = vpop.f32.mrf.mxu0 }
 0x162   : > { %v1334_v44 = vpop.f32.mrf.mxu1  ;;  %v1294_v45 = vadd.f32 %v1293_v42, %v479_v40 }
 0x163   : > { %v1295_v46 = vpop.f32.mrf.mxu0 }
 0x164   : > { %v1336_v47 = vpop.f32.mrf.mxu1  ;;  %v1296_v48 = vadd.f32 %v1295_v46, %v483_v41  ;;  %v1335_v49 = vadd.f32 %v1334_v44, %v1294_v45 }
 0x165   : > { %v1297_v50 = vpop.f32.mrf.mxu0 }
 0x166   : > { %v1338_v51 = vpop.f32.mrf.mxu1  ;;  %v1337_v52 = vadd.f32 %v1336_v47, %v1296_v48 }
 0x167   : > { %v1298_v53 = vpop.f32.mrf.mxu0 }
 0x168   : > { %v1339_v54 = vpop.f32.mrf.mxu1 }
 0x182   : > { %v1842_v55 = vpop.f32.mrf.mxu1 }
 0x184   : > { %v1843_v56 = vpop.f32.mrf.mxu1 }
 0x185   : > { %v1844_v19 = vadd.f32 %v1843_v56, %v1842_v55 }
 0x186   : > { %v1845_v57 = vpop.f32.mrf.mxu1 }
 0x187   : > { %v1417_v20 = vadd.f32 %v1844_v19, %v487_v17 }
 0x188   : > { %v1846_v58 = vpop.f32.mrf.mxu1 }
 0x1a1   : > { %v1375_v59 = vpop.f32.mrf.mxu0 }
 0x1a2   : > { %v1864_v60 = vpop.f32.mrf.mxu1  ;;  %v1376_v61 = vadd.f32 %v1375_v59, %v1335_v49 }
 0x1a3   : > { %v1377_v62 = vpop.f32.mrf.mxu0 }
 0x1a4   : > { %v1865_v63 = vpop.f32.mrf.mxu1  ;;  %v1505_v0 = vmul.f32 0.70710677, %v1376_v61  ;;  %v1378_v1 = vadd.f32 %v1377_v62, %v1337_v52  ;;  %v1502_v10 = vmul.f32 0.5, %v1376_v61 }
 0x1a5   : > { %v1379_v2 = vpop.f32.mrf.mxu0  ;;  %v1866_v21 = vadd.f32 %v1865_v63, %v1864_v60 }
 0x1a6   : > { %v1867_v4 = vpop.f32.mrf.mxu1  ;;  %2156 = verf.f32 %v1505_v0  ;;  %v1506_v5 = vmul.f32 0.70710677, %v1378_v1  ;;  %v1503_v11 = vmul.f32 0.5, %v1378_v1 }
 0x1a7   : > { %v1380_v3 = vpop.f32.mrf.mxu0  ;;  %v1457_v24 = vadd.f32 %v1866_v21, %v1417_v20 }
 0x1a8   : > { %v1868_v6 = vpop.f32.mrf.mxu1  ;;  %2158 = verf.f32 %v1506_v5 }
 0x1b3   : > { %v2157_v7 = vpop.eup %2156 }
 0x1b4   : > { %v1511_v8 = vadd.f32 1.0, %v2157_v7 }
 0x1b5   : > { %v2159_v9 = vpop.eup %2158 }
 0x1b6   : > { %v1512_v12 = vadd.f32 1.0, %v2159_v9  ;;  %v1514_v14 = vmul.f32 %v1511_v8, %v1502_v10 }
 0x1b8   : > { %v1515_v15 = vmul.f32 %v1512_v12, %v1503_v11 }
 0x1ba   : > { %v1818_v16 = vpack.c.bf16 %v1515_v15, %v1514_v14 }
 0x1bc   : > { %v1530_v38 = vrot.slane %v1818_v16, %v1529_v35 }
 0x1c1   : > { %v1886_v22 = vpop.f32.mrf.mxu0 }
 0x1c3   : > { %v1887_v23 = vpop.f32.mrf.mxu0 }
 0x1c4   : > { %v1888_v25 = vadd.f32 %v1887_v23, %v1886_v22 }
 0x1c5   : > { %v1889_v26 = vpop.f32.mrf.mxu0 }
 0x1c6   : > { %v1497_v27 = vadd.f32 %v1888_v25, %v1457_v24 }
 0x1c7   : > { %v1890_v28 = vpop.f32.mrf.mxu0 }
 0x1c8   : > { %v1507_v29 = vmul.f32 0.70710677, %v1497_v27  ;;  %v1504_v33 = vmul.f32 0.5, %v1497_v27 }
 0x1ca   : > { %2160 = verf.f32 %v1507_v29 }
 0x1d7   : > { %v2161_v32 = vpop.eup %2160 }
 0x1d8   : > { %v1513_v34 = vadd.f32 1.0, %v2161_v32 }
 0x1da   : > { %v1516_v36 = vmul.f32 %v1513_v34, %v1504_v33 }
 0x1dc   : > { %v1519_v37 = vpack.c.bf16 %v1516_v36, %v1516_v36 }
 0x1de   : > { %v1537_v39 = vrot.slane %v1519_v37, %v1529_v35 }
 0x1e0   : > { %v1538_v40 = vcombine.low %v1530_v38, %v1537_v39 }
 0x1e2   : > { %1819 = vst.sshfl [vmem:[%s236_s17] sm:$0x15 pattern:$0x73625140] %v1538_v40 }
 0x1e3   : > { %2257 = shalt.err (!%p2254_p11)
}
 0x1e4   : > { %s2258_s21 = scalar_lea.hbm %s1561_s10, 48  ;;  %s2262_s23 = scalar_lea.hbm %s2735_s3, 96 }
 0x1e5   : > { %p2259_p3 = scmp.ne.s32.totalorder %s1561_s10, %s2258_s21  ;;  %p2263_p13 = scmp.lt.s32.totalorder %s1561_s10, %s2735_s3 }
 0x1e6   : > { %p2264_p10 = scmp.lt.s32.totalorder %s2262_s23, %s2258_s21 }
 0x1e7   : > { %p2260_p12 = pnand %p2259_p3, %p2751_p4 }
 0x1e8   : > { %p2265_p6 = por %p2264_p10, %p2263_p13 }
 0x1e9   : > { %p2261_p8 = pneg %p2260_p12 }
 0x1eb   : > { %p2266_p2 = pnand %p2265_p6, %p2261_p8 }
 0x1ed   : > { %2269 = shalt.err (!%p2266_p2)
}
 0x1ee   : > { %1904 = dma.vmem_to_hbm [thread:$0]  (%p2751_p4), %s1564_s20, 48, %s1561_s10, %s1549_s9  }
 0x1ef PF: > { %s1575_s30 = sand.u32 1, %s2300_s12   ;;  %p2752_p9 = scmp.ne.s32.totalorder %s2743_s29, 0 }
 0x1f0   : > { %p2753_p1 = scmp.ge.s32.totalorder %s2312_s15, 2  ;;  %s1576_s28 = scalar_lea.sflag [#allocation4], %s1575_s30 }
 0x1f2   : > { %p1918_p7 = pnand %p2753_p1, %p2752_p9 }
 0x1f4   : > { %p1919_p0 = pneg %p1918_p7 }
 0x1f6   : > { %2295 = dma.done.wait (%p1919_p0), %s1576_s28, 48  }
 0x1f7   : > { %2297 = vsyncadd (%p1919_p0), %s1576_s28, 4294967248  ;;  %p17_p5 = scmp.ge.s32.totalorder %s2364_s16, 4   ;;  %s2754_s12 = smov %s2304_s13 }
 0x1f8   : > { %s2755_s13 = smov %s2308_s14  ;;  %s2756_s14 = smov %s2375_s19 }
 0x1f9   : > { %s2757_s15 = smov %s2364_s16  ;;  %19 = sbr.rel (!%p17_p5) target bundleno = 6 (0x6), region = 93 }
 0x1fe   :  { %1581 = vsyncpa [#allocation3], 1 }
 0x1ff   :  { %1583 = vsyncpa [#allocation3 + $0x1], 1 }
 0x200   :  { %1584 = vsyncpa [#allocation6], 1 }
 0x201   :  { %1586 = vsyncpa [#allocation6 + $0x1], 1 }
 0x202   :  { %1587 = vsyncpa [#allocation4], 1 }
 0x203   :  { %1589 = vsyncpa [#allocation4 + $0x1], 1 }

</bundles_post_ra>
